<compile_context>
chip_gen: v6e
topology: v6e:2x2x1
jax: 0.10.0
libtpu: 0.0.40
codegen_flags: <defaults>
</compile_context>

<pallas_src>
import math
import numpy as np
import jax
import jax.numpy as jnp
from jax.experimental import pallas as pl
from jax.experimental.pallas import tpu as pltpu


# ----------------------------------------------------------------------------
# MADE mask construction (same semantics as create_masks in the reference repo,
# sequential input order, no custom input_degrees).
# ----------------------------------------------------------------------------
def create_masks(input_size, hidden_size, n_hidden):
    degrees = [np.arange(input_size)]
    for _ in range(n_hidden + 1):
        degrees.append(np.arange(hidden_size) % (input_size - 1))
    degrees.append(np.arange(input_size) % input_size - 1)

    masks = []
    for d0, d1 in zip(degrees[:-1], degrees[1:]):
        # mask shape (out, in), matching F.linear's weight layout
        masks.append((d1[:, None] >= d0[None, :]).astype(np.float32))
    return masks, degrees[0]


# ----------------------------------------------------------------------------
# Pallas kernel (fixed n_hidden = 2 structure, matching the parameters below):
#   h = relu(W @ h + b) chain  ->  two D-wide heads (m, loga)
#   u = (x - m) * exp(-loga),  log|det J| = -loga
# All arrays are batch-on-lane: x/u/nloga are (D, TB), hiddens are (H, TB).
# ----------------------------------------------------------------------------
def made_kernel(x_ref,
                w0_ref, b0_ref,
                w1_ref, b1_ref,
                w2_ref, b2_ref,
                w3m_ref, b3m_ref,
                w3a_ref, b3a_ref,
                u_ref, nloga_ref):
    x = x_ref[...]                                     # (D, TB) f32

    # net_input: MaskedLinear(D -> H)
    h = jnp.dot(w0_ref[...], x.astype(jnp.bfloat16),
                preferred_element_type=jnp.float32) + b0_ref[...]

    # hidden layer 1: ReLU -> MaskedLinear(H -> H)
    h = jnp.maximum(h, 0.0)
    h = jnp.dot(w1_ref[...], h.astype(jnp.bfloat16),
                preferred_element_type=jnp.float32) + b1_ref[...]

    # hidden layer 2: ReLU -> MaskedLinear(H -> H)
    h = jnp.maximum(h, 0.0)
    h = jnp.dot(w2_ref[...], h.astype(jnp.bfloat16),
                preferred_element_type=jnp.float32) + b2_ref[...]

    # output layer: ReLU -> two D-wide masked-linear heads (no lane slicing)
    h = jnp.maximum(h, 0.0)
    hb = h.astype(jnp.bfloat16)
    m = jnp.dot(w3m_ref[...], hb, preferred_element_type=jnp.float32) + b3m_ref[...]
    loga = jnp.dot(w3a_ref[...], hb, preferred_element_type=jnp.float32) + b3a_ref[...]

    # elementwise flow transform (f32)
    u_ref[...] = (x - m) * jnp.exp(-loga)
    nloga_ref[...] = -loga


def made_forward(x, masked_ws, biases, *, tb=256):
    """x: (B, D) f32.
    masked_ws: [w0, w1, w2, w3_m, w3_loga], each (out, in) bf16, mask already applied.
    biases   : matching (out, 1) f32.
    Returns (u, log_abs_det_jacobian), each (B, D) f32."""
    B, D = x.shape
    assert tb % 128 == 0, "batch tile must be lane-aligned (multiple of 128)"

    nb = pl.cdiv(B, tb)
    Bp = nb * tb
    x_p = x if Bp == B else jnp.pad(x, ((0, Bp - B), (0, 0)))
    x_t = x_p.T                                        # (D, Bp): batch on lane axis

    # Data specs walk the batch (lane) axis; parameter specs stay resident.
    data_spec = pl.BlockSpec((D, tb), lambda i: (0, i))
    flat_params, param_specs = [], []
    for w, b in zip(masked_ws, biases):
        flat_params += [w, b]
        param_specs += [pl.BlockSpec(w.shape, lambda i: (0, 0)),
                        pl.BlockSpec(b.shape, lambda i: (0, 0))]

    u_t, nloga_t = pl.pallas_call(
        made_kernel,
        out_shape=(jax.ShapeDtypeStruct((D, Bp), jnp.float32),
                   jax.ShapeDtypeStruct((D, Bp), jnp.float32)),
        grid=(nb,),
        in_specs=[data_spec] + param_specs,
        out_specs=(data_spec, data_spec),
        compiler_params=pltpu.CompilerParams(dimension_semantics=("parallel",)),
    )(x_t, *flat_params)

    # layout plumbing back to the module's (B, D) convention
    return u_t.T[:B], nloga_t.T[:B]


# ----------------------------------------------------------------------------
# Plain-JAX reference (mirrors the PyTorch forward, same bf16-weight / f32-acc
# numerics) for a correctness check.
# ----------------------------------------------------------------------------
def made_ref(x, masked_ws, biases):
    def lin(h, w, b):   # w: (out, in) bf16, b: (out, 1) f32
        return jnp.dot(h.astype(jnp.bfloat16), w.T,
                       preferred_element_type=jnp.float32) + b[:, 0]

    h = lin(x, masked_ws[0], biases[0])
    h = lin(jnp.maximum(h, 0.0), masked_ws[1], biases[1])
    h = lin(jnp.maximum(h, 0.0), masked_ws[2], biases[2])
    hr = jnp.maximum(h, 0.0)
    m = lin(hr, masked_ws[3], biases[3])
    loga = lin(hr, masked_ws[4], biases[4])
    return (x - m) * jnp.exp(-loga), -loga


if __name__ == "__main__":
    # MADE(input_size=8, hidden_size=32, n_hidden=2); batch big enough to exercise the grid.
    B, D, H, N_HIDDEN = 1024, 8, 32, 2
    TB = 256                                           # lane tile (4 grid steps)

    masks, input_degrees = create_masks(D, H, N_HIDDEN)
    # Layer (out, in) shapes exactly as in the nn.Module __init__:
    #   net_input: (H, D)  mask=masks[0]
    #   hidden i : (H, H)  mask=masks[1+i]
    #   output   : (2D, H) mask=masks[-1].repeat(2, 1)
    layer_masks = [masks[0]] + masks[1:-1] + [np.tile(masks[-1], (2, 1))]
    in_dims = [D] + [H] * N_HIDDEN + [H]
    out_dims = [H] + [H] * N_HIDDEN + [2 * D]

    # Deterministic parameter init (nn.Linear-style uniform(-1/sqrt(in), 1/sqrt(in)))
    key = jax.random.PRNGKey(0)
    masked_ws, biases = [], []
    for din, dout, mask in zip(in_dims, out_dims, layer_masks):
        key, kw, kb = jax.random.split(key, 3)
        bound = 1.0 / math.sqrt(din)
        w = jax.random.uniform(kw, (dout, din), jnp.float32, -bound, bound)   # (out, in)
        b = jax.random.uniform(kb, (dout,), jnp.float32, -bound, bound)
        # mask applied in f32 glue, then weight cast to bf16 (masks exact in bf16)
        masked_ws.append((w * jnp.asarray(mask)).astype(jnp.bfloat16))
        biases.append(b.reshape(dout, 1))

    # Split the (2D, H) output head into m / loga heads -> two clean (D, H) matmuls.
    w3, b3 = masked_ws.pop(), biases.pop()
    masked_ws += [w3[:D], w3[D:]]
    biases += [b3[:D], b3[D:]]

    # TODO(synk): conditional path (cond_label_size / y) not exercised; y=None case only.

    key, kx = jax.random.split(key)
    x = jax.random.normal(kx, (B, D), jnp.float32)

    u, logdet = made_forward(x, masked_ws, biases, tb=TB)
    jax.block_until_ready((u, logdet))

    u_ref, logdet_ref = made_ref(x, masked_ws, biases)
    assert u.shape == (B, D) and logdet.shape == (B, D)
    np.testing.assert_allclose(np.asarray(u), np.asarray(u_ref), rtol=2e-3, atol=2e-3)
    np.testing.assert_allclose(np.asarray(logdet), np.asarray(logdet_ref), rtol=2e-3, atol=2e-3)

    print("KERNEL_OK")
</pallas_src>

<mosaic_0001>
module attributes {stable_mosaic.version = 11 : i64} {
  func.func @made_kernel(%arg0: i32, %arg1: memref<8x256xf32, #tpu.memory_space<vmem>>, %arg2: memref<32x8xbf16, #tpu.memory_space<vmem>>, %arg3: memref<32x1xf32, #tpu.memory_space<vmem>>, %arg4: memref<32x32xbf16, #tpu.memory_space<vmem>>, %arg5: memref<32x1xf32, #tpu.memory_space<vmem>>, %arg6: memref<32x32xbf16, #tpu.memory_space<vmem>>, %arg7: memref<32x1xf32, #tpu.memory_space<vmem>>, %arg8: memref<8x32xbf16, #tpu.memory_space<vmem>>, %arg9: memref<8x1xf32, #tpu.memory_space<vmem>>, %arg10: memref<8x32xbf16, #tpu.memory_space<vmem>>, %arg11: memref<8x1xf32, #tpu.memory_space<vmem>>, %arg12: memref<8x256xf32, #tpu.memory_space<vmem>>, %arg13: memref<8x256xf32, #tpu.memory_space<vmem>>) attributes {dimension_semantics = [#tpu.dimension_semantics<parallel>], iteration_bounds = array<i64: 4>, scalar_prefetch = 0 : i64, scratch_operands = 0 : i64, tpu.core_type = #tpu.core_type<tc>, window_params = [{transform_indices = @transform_0, window_bounds = array<i64: 8, 256>}, {pipeline_mode = #tpu.pipeline_mode<synchronous>, transform_indices = @transform_1, window_bounds = array<i64: 32, 8>}, {pipeline_mode = #tpu.pipeline_mode<synchronous>, transform_indices = @transform_2, window_bounds = array<i64: 32, 1>}, {pipeline_mode = #tpu.pipeline_mode<synchronous>, transform_indices = @transform_3, window_bounds = array<i64: 32, 32>}, {pipeline_mode = #tpu.pipeline_mode<synchronous>, transform_indices = @transform_4, window_bounds = array<i64: 32, 1>}, {pipeline_mode = #tpu.pipeline_mode<synchronous>, transform_indices = @transform_5, window_bounds = array<i64: 32, 32>}, {pipeline_mode = #tpu.pipeline_mode<synchronous>, transform_indices = @transform_6, window_bounds = array<i64: 32, 1>}, {pipeline_mode = #tpu.pipeline_mode<synchronous>, transform_indices = @transform_7, window_bounds = array<i64: 8, 32>}, {pipeline_mode = #tpu.pipeline_mode<synchronous>, transform_indices = @transform_8, window_bounds = array<i64: 8, 1>}, {pipeline_mode = #tpu.pipeline_mode<synchronous>, transform_indices = @transform_9, window_bounds = array<i64: 8, 32>}, {pipeline_mode = #tpu.pipeline_mode<synchronous>, transform_indices = @transform_10, window_bounds = array<i64: 8, 1>}, {transform_indices = @transform_11, window_bounds = array<i64: 8, 256>}, {transform_indices = @transform_12, window_bounds = array<i64: 8, 256>}]} {
    %c0 = arith.constant 0 : index
    %c0_0 = arith.constant 0 : index
    %0 = vector.load %arg1[%c0, %c0_0] : memref<8x256xf32, #tpu.memory_space<vmem>>, vector<8x256xf32>
    %c0_1 = arith.constant 0 : index
    %c0_2 = arith.constant 0 : index
    %1 = vector.load %arg2[%c0_1, %c0_2] : memref<32x8xbf16, #tpu.memory_space<vmem>>, vector<32x8xbf16>
    %2 = arith.truncf %0 : vector<8x256xf32> to vector<8x256xbf16>
    %cst = arith.constant dense<0.000000e+00> : vector<32x256xf32>
    %3 = tpu.matmul %1, %2, %cst {dimension_numbers = #tpu.dot_dimension_numbers<[1], [0], [0], [1], [0, 0, 1, 1], [], []>} : vector<32x8xbf16>, vector<8x256xbf16>, vector<32x256xf32> -> vector<32x256xf32>
    %c0_3 = arith.constant 0 : index
    %c0_4 = arith.constant 0 : index
    %4 = vector.load %arg3[%c0_3, %c0_4] : memref<32x1xf32, #tpu.memory_space<vmem>>, vector<32x1xf32>
    %5 = vector.broadcast %4 : vector<32x1xf32> to vector<32x256xf32>
    %6 = arith.addf %3, %5 : vector<32x256xf32>
    %cst_5 = arith.constant 0.000000e+00 : f32
    %7 = vector.broadcast %cst_5 : f32 to vector<32x256xf32>
    %8 = arith.maximumf %6, %7 : vector<32x256xf32>
    %c0_6 = arith.constant 0 : index
    %c0_7 = arith.constant 0 : index
    %9 = vector.load %arg4[%c0_6, %c0_7] : memref<32x32xbf16, #tpu.memory_space<vmem>>, vector<32x32xbf16>
    %10 = arith.truncf %8 : vector<32x256xf32> to vector<32x256xbf16>
    %cst_8 = arith.constant dense<0.000000e+00> : vector<32x256xf32>
    %11 = tpu.matmul %9, %10, %cst_8 {dimension_numbers = #tpu.dot_dimension_numbers<[1], [0], [0], [1], [0, 0, 1, 1], [], []>} : vector<32x32xbf16>, vector<32x256xbf16>, vector<32x256xf32> -> vector<32x256xf32>
    %c0_9 = arith.constant 0 : index
    %c0_10 = arith.constant 0 : index
    %12 = vector.load %arg5[%c0_9, %c0_10] : memref<32x1xf32, #tpu.memory_space<vmem>>, vector<32x1xf32>
    %13 = vector.broadcast %12 : vector<32x1xf32> to vector<32x256xf32>
    %14 = arith.addf %11, %13 : vector<32x256xf32>
    %cst_11 = arith.constant 0.000000e+00 : f32
    %15 = vector.broadcast %cst_11 : f32 to vector<32x256xf32>
    %16 = arith.maximumf %14, %15 : vector<32x256xf32>
    %c0_12 = arith.constant 0 : index
    %c0_13 = arith.constant 0 : index
    %17 = vector.load %arg6[%c0_12, %c0_13] : memref<32x32xbf16, #tpu.memory_space<vmem>>, vector<32x32xbf16>
    %18 = arith.truncf %16 : vector<32x256xf32> to vector<32x256xbf16>
    %cst_14 = arith.constant dense<0.000000e+00> : vector<32x256xf32>
    %19 = tpu.matmul %17, %18, %cst_14 {dimension_numbers = #tpu.dot_dimension_numbers<[1], [0], [0], [1], [0, 0, 1, 1], [], []>} : vector<32x32xbf16>, vector<32x256xbf16>, vector<32x256xf32> -> vector<32x256xf32>
    %c0_15 = arith.constant 0 : index
    %c0_16 = arith.constant 0 : index
    %20 = vector.load %arg7[%c0_15, %c0_16] : memref<32x1xf32, #tpu.memory_space<vmem>>, vector<32x1xf32>
    %21 = vector.broadcast %20 : vector<32x1xf32> to vector<32x256xf32>
    %22 = arith.addf %19, %21 : vector<32x256xf32>
    %cst_17 = arith.constant 0.000000e+00 : f32
    %23 = vector.broadcast %cst_17 : f32 to vector<32x256xf32>
    %24 = arith.maximumf %22, %23 : vector<32x256xf32>
    %25 = arith.truncf %24 : vector<32x256xf32> to vector<32x256xbf16>
    %c0_18 = arith.constant 0 : index
    %c0_19 = arith.constant 0 : index
    %26 = vector.load %arg8[%c0_18, %c0_19] : memref<8x32xbf16, #tpu.memory_space<vmem>>, vector<8x32xbf16>
    %cst_20 = arith.constant dense<0.000000e+00> : vector<8x256xf32>
    %27 = tpu.matmul %26, %25, %cst_20 {dimension_numbers = #tpu.dot_dimension_numbers<[1], [0], [0], [1], [0, 0, 1, 1], [], []>} : vector<8x32xbf16>, vector<32x256xbf16>, vector<8x256xf32> -> vector<8x256xf32>
    %c0_21 = arith.constant 0 : index
    %c0_22 = arith.constant 0 : index
    %28 = vector.load %arg9[%c0_21, %c0_22] : memref<8x1xf32, #tpu.memory_space<vmem>>, vector<8x1xf32>
    %29 = vector.broadcast %28 : vector<8x1xf32> to vector<8x256xf32>
    %30 = arith.addf %27, %29 : vector<8x256xf32>
    %c0_23 = arith.constant 0 : index
    %c0_24 = arith.constant 0 : index
    %31 = vector.load %arg10[%c0_23, %c0_24] : memref<8x32xbf16, #tpu.memory_space<vmem>>, vector<8x32xbf16>
    %cst_25 = arith.constant dense<0.000000e+00> : vector<8x256xf32>
    %32 = tpu.matmul %31, %25, %cst_25 {dimension_numbers = #tpu.dot_dimension_numbers<[1], [0], [0], [1], [0, 0, 1, 1], [], []>} : vector<8x32xbf16>, vector<32x256xbf16>, vector<8x256xf32> -> vector<8x256xf32>
    %c0_26 = arith.constant 0 : index
    %c0_27 = arith.constant 0 : index
    %33 = vector.load %arg11[%c0_26, %c0_27] : memref<8x1xf32, #tpu.memory_space<vmem>>, vector<8x1xf32>
    %34 = vector.broadcast %33 : vector<8x1xf32> to vector<8x256xf32>
    %35 = arith.addf %32, %34 : vector<8x256xf32>
    %36 = arith.subf %0, %30 : vector<8x256xf32>
    %cst_28 = arith.constant 0.000000e+00 : f32
    %37 = vector.broadcast %cst_28 : f32 to vector<8x256xf32>
    %38 = arith.subf %37, %35 : vector<8x256xf32>
    %39 = math.exp %38 : vector<8x256xf32>
    %40 = arith.mulf %36, %39 : vector<8x256xf32>
    %c0_29 = arith.constant 0 : index
    %c0_30 = arith.constant 0 : index
    %41 = vector.load %arg12[%c0_29, %c0_30] : memref<8x256xf32, #tpu.memory_space<vmem>>, vector<8x256xf32>
    tpu.vector_store %arg12[%c0_29, %c0_30], %40 {strides = array<i32>} : memref<8x256xf32, #tpu.memory_space<vmem>>, vector<8x256xf32>,
    %cst_31 = arith.constant 0.000000e+00 : f32
    %42 = vector.broadcast %cst_31 : f32 to vector<8x256xf32>
    %43 = arith.subf %42, %35 : vector<8x256xf32>
    %c0_32 = arith.constant 0 : index
    %c0_33 = arith.constant 0 : index
    %44 = vector.load %arg13[%c0_32, %c0_33] : memref<8x256xf32, #tpu.memory_space<vmem>>, vector<8x256xf32>
    tpu.vector_store %arg13[%c0_32, %c0_33], %43 {strides = array<i32>} : memref<8x256xf32, #tpu.memory_space<vmem>>, vector<8x256xf32>,
    return
  }
  func.func @transform_0(%arg0: i32) -> (i32, i32) {
    %c0_i32 = arith.constant 0 : i32
    %c0_i32_0 = arith.constant 0 : i32
    return %c0_i32, %arg0 : i32, i32
  }
  func.func @transform_1(%arg0: i32) -> (i32, i32) {
    %c0_i32 = arith.constant 0 : i32
    %c0_i32_0 = arith.constant 0 : i32
    %c0_i32_1 = arith.constant 0 : i32
    return %c0_i32, %c0_i32_0 : i32, i32
  }
  func.func @transform_2(%arg0: i32) -> (i32, i32) {
    %c0_i32 = arith.constant 0 : i32
    %c0_i32_0 = arith.constant 0 : i32
    %c0_i32_1 = arith.constant 0 : i32
    return %c0_i32, %c0_i32_0 : i32, i32
  }
  func.func @transform_3(%arg0: i32) -> (i32, i32) {
    %c0_i32 = arith.constant 0 : i32
    %c0_i32_0 = arith.constant 0 : i32
    %c0_i32_1 = arith.constant 0 : i32
    return %c0_i32, %c0_i32_0 : i32, i32
  }
  func.func @transform_4(%arg0: i32) -> (i32, i32) {
    %c0_i32 = arith.constant 0 : i32
    %c0_i32_0 = arith.constant 0 : i32
    %c0_i32_1 = arith.constant 0 : i32
    return %c0_i32, %c0_i32_0 : i32, i32
  }
  func.func @transform_5(%arg0: i32) -> (i32, i32) {
    %c0_i32 = arith.constant 0 : i32
    %c0_i32_0 = arith.constant 0 : i32
    %c0_i32_1 = arith.constant 0 : i32
    return %c0_i32, %c0_i32_0 : i32, i32
  }
  func.func @transform_6(%arg0: i32) -> (i32, i32) {
    %c0_i32 = arith.constant 0 : i32
    %c0_i32_0 = arith.constant 0 : i32
    %c0_i32_1 = arith.constant 0 : i32
    return %c0_i32, %c0_i32_0 : i32, i32
  }
  func.func @transform_7(%arg0: i32) -> (i32, i32) {
    %c0_i32 = arith.constant 0 : i32
    %c0_i32_0 = arith.constant 0 : i32
    %c0_i32_1 = arith.constant 0 : i32
    return %c0_i32, %c0_i32_0 : i32, i32
  }
  func.func @transform_8(%arg0: i32) -> (i32, i32) {
    %c0_i32 = arith.constant 0 : i32
    %c0_i32_0 = arith.constant 0 : i32
    %c0_i32_1 = arith.constant 0 : i32
    return %c0_i32, %c0_i32_0 : i32, i32
  }
  func.func @transform_9(%arg0: i32) -> (i32, i32) {
    %c0_i32 = arith.constant 0 : i32
    %c0_i32_0 = arith.constant 0 : i32
    %c0_i32_1 = arith.constant 0 : i32
    return %c0_i32, %c0_i32_0 : i32, i32
  }
  func.func @transform_10(%arg0: i32) -> (i32, i32) {
    %c0_i32 = arith.constant 0 : i32
    %c0_i32_0 = arith.constant 0 : i32
    %c0_i32_1 = arith.constant 0 : i32
    return %c0_i32, %c0_i32_0 : i32, i32
  }
  func.func @transform_11(%arg0: i32) -> (i32, i32) {
    %c0_i32 = arith.constant 0 : i32
    %c0_i32_0 = arith.constant 0 : i32
    return %c0_i32, %arg0 : i32, i32
  }
  func.func @transform_12(%arg0: i32) -> (i32, i32) {
    %c0_i32 = arith.constant 0 : i32
    %c0_i32_0 = arith.constant 0 : i32
    return %c0_i32, %arg0 : i32, i32
  }
}

</mosaic_0001>

<bundles_post_ra>
// kernel: tpu_custom_call.1
= control target key start
LH: loop header
LB: loop body
LE: loop exit
PB: predicated region body
PF: predicated region fallthrough
CT: control target
= control target key end

     0   :  { %18 = vsyncpa [#allocation3], 0  ;;  %s1479_s0 = inlined_call_operand.vmem [shape: f32[8,1024], index: 0, kind: input, shape index: {}]   ;;  %s1480_s1 = inlined_call_operand.vmem [shape: bf16[32,8], index: 1, kind: input, shape index: {}]   ;;  %s1481_s2 = inlined_call_operand.vmem [shape: f32[32,1], index: 2, kind: input, shape index: {}]   ;;  %s1482_s3 = inlined_call_operand.vmem [shape: bf16[32,32], index: 3, kind: input, shape index: {}]   ;;  %s1483_s4 = inlined_call_operand.vmem [shape: f32[32,1], index: 4, kind: input, shape index: {}]   ;;  %s1484_s5 = inlined_call_operand.vmem [shape: bf16[32,32], index: 5, kind: input, shape index: {}]   ;;  %s1485_s6 = inlined_call_operand.vmem [shape: f32[32,1], index: 6, kind: input, shape index: {}]   ;;  %s1486_s7 = inlined_call_operand.vmem [shape: bf16[8,32], index: 7, kind: input, shape index: {}]   ;;  %s1487_s8 = inlined_call_operand.vmem [shape: f32[8,1], index: 8, kind: input, shape index: {}]   ;;  %s1488_s9 = inlined_call_operand.vmem [shape: bf16[8,32], index: 9, kind: input, shape index: {}]   ;;  %s1489_s10 = inlined_call_operand.vmem [shape: f32[8,1], index: 10, kind: input, shape index: {}]   ;;  %s1490_s11 = inlined_call_operand.hbm [shape: f32[8,1024], index: 11, kind: output, shape index: {0}]   ;;  %s1491_s12 = inlined_call_operand.hbm [shape: f32[8,1024], index: 12, kind: output, shape index: {1}]  }
   0x1   :  { %20 = vsyncpa [#allocation3 + $0x1], 0 }
   0x2   :  { %21 = vsyncpa [#allocation5], 0 }
   0x3   :  { %23 = vsyncpa [#allocation5 + $0x1], 0  ;;  %s1259_s21 = smov 0   ;;  %s1261_s22 = smov 0  }
   0x4   :  { %s1263_s23 = smov 0   ;;  %s1265_s24 = smov 0  }
   0x5 LB: > { %1498 = sst [smem:[#allocation8_spill]] %s1185_s23  ;;  %s1280_s25 = sadd.s32 4294967295, %s1189_s24   ;;  %s1189_s24 = sphi %s1265_s24, %s1507_s24   ;;  %s1185_s23 = sphi %s1263_s23, %s1509_s23   ;;  %s1181_s22 = sphi %s1261_s22, %s1511_s22   ;;  %s1177_s21 = sphi %s1259_s21, %s1510_s21  }
   0x6   : > { %s1009_s26 = sadd.s32 4294967294, %s1189_s24   ;;  %s1284_s27 = sadd.s32 1, %s1189_s24  }
   0x7   : > { %1499 = sst [smem:[#allocation9_spill]] %s1284_s27  ;;  %s272_s28 = sadd.s32 1, %s1185_s23 }
   0x8   : > { %s269_s29 = ssub.s32 %s1189_s24, %s1284_s27  ;;  %p282_p0 = scmp.ne.s32.totalorder %s1185_s23, %s1181_s22 }
   0x9   : > { %p270_p1 = scmp.eq.s32.totalorder %s269_s29, 0  ;;  %p283_p2 = scmp.eq.s32.totalorder %s1280_s25, 3 }
   0xa   : > { %p288_p3 = scmp.ne.s32.totalorder %s1181_s22, %s1177_s21  ;;  %p289_p4 = scmp.eq.s32.totalorder %s1009_s26, 3 }
   0xb   : > { %s1295_s30 = scalar_select %p270_p1, %s1185_s23, %s272_s28  }
   0xc   : > { %p1297_p5 = por %p283_p2, %p282_p0  ;;  %p1301_p6 = por %p289_p4, %p288_p3 }
   0xd   : > { %1500 = sst [smem:[#allocation10_spill]] %s1295_s30  ;;  %p1012_p7 = scmp.ge.s32.totalorder %s1189_s24, 1 }
   0xe   : > { %s1502_s14 = scalar_select %p1301_p6, 1, 0 }
   0xf   : > { %p372_p8 = scmp.lt.s32.totalorder %s1189_s24, 5 }
  0x10   : > { %1503 = sst [smem:[#allocation11_spill]] %s1502_s14 }
  0x11   : > { %p373_p9 = pnand %p1012_p7, %p372_p8 }
  0x12   : > { %s1015_s15 = sshll.u32 (!%p373_p9), %s1280_s25, 1  ;;  %s1404_s26 = sand.u32 (!%p373_p9), 1, %s1181_s22  }
  0x13   : > { %376 = sbr.rel (%p373_p9) target bundleno = 947 (0x3b3), region = 64  ;;  %p420_p10 = scmp.lt.s32.totalorder (!%p373_p9), %s1015_s15, 7 }
  0x14   : > { %s1496_s29 = sshll.u32 (!%p373_p9), %s1280_s25, 8  ;;  %s890_s30 = scalar_lea.sflag (!%p373_p9), [#allocation5], %s1404_s26 }
  0x15   : > { %s1415_s27 = scalar_lea.hbm (!%p373_p9), %s1491_s12, %s1496_s29  ;;  %s1192_s14 = smov (!%p373_p9), [#allocation4]  }
  0x16   : > { %s1103_s19 = sshll.u32 (!%p373_p9), %s1192_s14, 4  ;;  %s1104_s19 = int_to_ptr.vmem [resolvable:$false] %s1103_s19 }
  0x17   : > { %s1105_s20 = scalar_lea.vmem (!%p373_p9), %s1104_s19, 512 }
  0x18   : > { %v1191_v0 = vmov 0   ;;  %v438_v1 = vld [vmem:[%s1481_s2 + $0x10] sm:$0xff]  ;;  %s1513_s15 = smov (!%p420_p10, %s1015_s15), 7  ;;  %v436_v2 = vld [vmem:[%s1481_s2] sm:$0xff]  ;;  %v439_v3 = vld [vmem:[%s1481_s2 + $0x18] sm:$0xff]  ;;  %vm477_vm0 = vcmask 1043456  }
  0x19   : > { %516 = vmatprep.mubr.bf16.mxu0 %v1191_v0  ;;  %1087 = vset.pattern.permute.xlu0 %v1191_v0  ;;  %s1016_s28 = sshll.u32 %s1513_s15, 3  ;;  %v437_v4 = vld [vmem:[%s1481_s2 + $0x8] sm:$0xff]  ;;  %v555_v5 = vld [vmem:[%s1483_s4 + $0x10] sm:$0xff]  ;;  %v556_v8 = vld [vmem:[%s1483_s4 + $0x18] sm:$0xff]  ;;  %vm470_vm1 = vcmask 64512   ;;  %vm587_vm2 = vcmask 261120  }
  0x1a   : > { %1088 = vset.pattern.permute.xlu1 %v1191_v0  ;;  %626 = vmatprep.mubr.bf16.mxu1 %v1191_v0  ;;  %s423_s23 = scalar_lea.vmem %s1479_s0, %s1016_s28  ;;  %v1089_v12 = vld [vmem:[%s1480_s1] sm:$0xff]   ;;  %v554_v14 = vld [vmem:[%s1483_s4 + $0x8] sm:$0xff]  ;;  %v665_v15 = vld [vmem:[%s1485_s6 + $0x10] sm:$0xff]  ;;  %s1497_s28 = sshll.u32 %s1404_s26, 4 }
  0x1b   : > { %452 = vperm.xlu0 %1087, %v438_v1   ;;  %442 = vperm.xlu1 %1088, %v436_v2   ;;  %v1330_v6 = vld [vmem:[%s423_s23 + $0x8] sm:$0xff]  ;;  %v1332_v7 = vld [vmem:[%s423_s23] sm:$0xff]  ;;  %v666_v16 = vld [vmem:[%s1485_s6 + $0x18] sm:$0xff]  ;;  %s418_s16 = scalar_lea.vmem [#allocation4], %s1497_s28 }
  0x1c   : > { %v435_v9 = vpack.c.bf16 %v1330_v6, %v1330_v6  ;;  %v434_v10 = vpack.c.bf16 %v1332_v7, %v1332_v7  ;;  %v553_v13 = vld [vmem:[%s1483_s4] sm:$0xff]  ;;  %v1090_v17 = vld [vmem:[%s1480_s1 + $0x8] sm:$0xff]   ;;  %s918_s17 = sshll.u32 %s418_s16, 4  ;;  %s1417_s17 = int_to_ptr.vmem [resolvable:$true] %s918_s17 }
  0x1d   : > { %v663_v18 = vld [vmem:[%s1485_s6] sm:$0xff]  ;;  %v664_v19 = vld [vmem:[%s1485_s6 + $0x8] sm:$0xff]  ;;  %s1099_s23 = scalar_lea.vmem %s1417_s17, 256  ;;  %p1106_p0 = scmp.lt.s32.totalorder %s1417_s17, %s1104_s19 }
  0x1e   : > { %1019 = vmatprep.subr.msk.bf16.mxu0 %vm477_vm0, %v435_v9  ;;  %v479_v11 = vsel %vm477_vm0, %v434_v10, 0  ;;  %v820_v20 = vld [vmem:[%s1489_s10] sm:$0xff]  ;;  %v1092_v55 = vld [vmem:[%s1482_s3 + $0x8] sm:$0xff]   ;;  %p1100_p11 = scmp.ne.s32.totalorder %s1417_s17, %s1099_s23  ;;  %p1107_p1 = scmp.lt.s32.totalorder %s1105_s20, %s1099_s23 }
  0x1f   : > { %457 = vperm.xlu0 %1087, %v439_v3   ;;  %447 = vperm.xlu1 %1088, %v437_v4   ;;  %v769_v21 = vld [vmem:[%s1487_s8] sm:$0xff] }
  0x20   : > { %499 = vmatpush1.bf16.msra.mxu0 %v479_v11  ;;  %v1091_v54 = vld [vmem:[%s1482_s3] sm:$0xff]   ;;  %p1101_p12 = pnand %p1100_p11, %p1297_p5  ;;  %p1108_p2 = por %p1107_p1, %p1106_p0 }
  0x22   : > { %p1102_p13 = pneg %p1101_p12 }
  0x23   : > { %569 = vperm.xlu0 %1087, %v555_v5   ;;  %574 = vperm.xlu1 %1088, %v556_v8  }
  0x24   : > { %1020 = vmatmul.mubr.msk.bf16.vlgmr.msra.gmra.mxu0 %vm470_vm1, %v1089_v12  ;;  %p1109_p3 = pnand %p1108_p2, %p1102_p13 }
  0x25   : > { %526 = vmatprep.mubr.bf16.mxu0 %v1191_v0 }
  0x27   : > { %559 = vperm.xlu0 %1087, %v553_v13   ;;  %564 = vperm.xlu1 %1088, %v554_v14  }
  0x2b   : > { %679 = vperm.xlu0 %1087, %v665_v15   ;;  %684 = vperm.xlu1 %1088, %v666_v16  }
  0x2c   : > { %1021 = vmatmul.mubr.msk.bf16.gmra.mxu0 %vm470_vm1, %v1090_v17 }
  0x2d   : > { %735 = vmatprep.mubr.bf16.mxu0 %v1191_v0 }
  0x2f   : > { %669 = vperm.xlu0 %1087, %v663_v18   ;;  %674 = vperm.xlu1 %1088, %v664_v19  }
  0x33   : > { %823 = vperm.xlu0 %1087, %v820_v20   ;;  %772 = vperm.xlu1 %1088, %v769_v21  }
  0x96   : > { %v453_v25 = vpop.permute.xlu0 %452  ;;  %v443_v26 = vpop.permute.xlu1 %442 }
  0x9a   : > { %v458_v30 = vpop.permute.xlu0 %457  ;;  %v448_v31 = vpop.permute.xlu1 %447 }
  0x9e   : > { %v575_v59 = vpop.permute.xlu1 %574  ;;  %v570_v61 = vpop.permute.xlu0 %569 }
  0xa2   : > { %v565_v1 = vpop.permute.xlu1 %564  ;;  %v560_v8 = vpop.permute.xlu0 %559 }
  0xe4   : > { %v518_v22 = vpop.f32.mrf.mxu0 }
  0xe5   : > { %v519_v45 = vadd.f32 %v518_v22, %v443_v26 }
  0xe6   : > { %v520_v23 = vpop.f32.mrf.mxu0 }
  0xe7   : > { %v521_v38 = vadd.f32 %v520_v23, %v443_v26  ;;  %v537_v52 = vmax.f32 %v519_v45, 0.0 }
  0xe8   : > { %v522_v24 = vpop.f32.mrf.mxu0 }
  0xe9   : > { %v523_v40 = vadd.f32 %v522_v24, %v448_v31  ;;  %v538_v47 = vmax.f32 %v521_v38, 0.0 }
  0xea   : > { %v524_v27 = vpop.f32.mrf.mxu0 }
  0xeb   : > { %v525_v33 = vadd.f32 %v524_v27, %v448_v31  ;;  %v539_v49 = vmax.f32 %v523_v40, 0.0  ;;  %v1093_v27 = vld [vmem:[%s1484_s5] sm:$0xff]  }
  0xec   : > { %v528_v28 = vpop.f32.mrf.mxu0 }
  0xed   : > { %v529_v36 = vadd.f32 %v528_v28, %v453_v25  ;;  %v540_v42 = vmax.f32 %v525_v33, 0.0  ;;  %v549_v53 = vpack.c.bf16 %v539_v49, %v537_v52  ;;  %v1094_v28 = vld [vmem:[%s1484_s5 + $0x8] sm:$0xff]  }
  0xee   : > { %v530_v29 = vpop.f32.mrf.mxu0 }
  0xef   : > { %v531_v34 = vadd.f32 %v530_v29, %v453_v25  ;;  %v541_v46 = vmax.f32 %v529_v36, 0.0  ;;  %v550_v51 = vpack.c.bf16 %v540_v42, %v538_v47 }
  0xf0   : > { %v532_v32 = vpop.f32.mrf.mxu0 }
  0xf1   : > { %v533_v35 = vadd.f32 %v532_v32, %v458_v30  ;;  %v542_v43 = vmax.f32 %v531_v34, 0.0  ;;  %v685_v32 = vpop.permute.xlu1 %684  ;;  %v680_v34 = vpop.permute.xlu0 %679 }
  0xf2   : > { %v534_v37 = vpop.f32.mrf.mxu0 }
  0xf3   : > { %v535_v39 = vadd.f32 %v534_v37, %v458_v30  ;;  %v543_v41 = vmax.f32 %v533_v35, 0.0 }
  0xf5   : > { %v544_v44 = vmax.f32 %v535_v39, 0.0  ;;  %v551_v50 = vpack.c.bf16 %v543_v41, %v541_v46  ;;  %v675_v37 = vpop.permute.xlu1 %674  ;;  %v670_v42 = vpop.permute.xlu0 %669 }
  0xf7   : > { %v552_v48 = vpack.c.bf16 %v544_v44, %v542_v43 }
  0xf9   : > { %606 = vmatprep.subr.bf16.mxu1 %v552_v48 }
  0xfa   : > { %607 = vmatpush1.bf16.msra.mxu1 %v551_v50 }
  0xfb   : > { %608 = vmatprep.subr.bf16.mxu1 %v550_v51 }
  0xfe   : > { %609 = vmatpush1.bf16.msra.mxu1 %v549_v53 }
 0x101   : > { %1024 = vmatmul.mubr.msk.bf16.vlgmr.msra.gmra.mxu1 %vm587_vm2, %v1091_v54 }
 0x102   : > { %636 = vmatprep.mubr.bf16.mxu1 %v1191_v0 }
 0x109   : > { %1025 = vmatmul.mubr.msk.bf16.gmra.mxu1 %vm587_vm2, %v1092_v55 }
 0x10a   : > { %810 = vmatprep.mubr.bf16.mxu1 %v1191_v0 }
 0x1c1   : > { %v628_v56 = vpop.f32.mrf.mxu1 }
 0x1c2   : > { %v629_v18 = vadd.f32 %v628_v56, %v560_v8 }
 0x1c3   : > { %v630_v57 = vpop.f32.mrf.mxu1 }
 0x1c4   : > { %v631_v11 = vadd.f32 %v630_v57, %v560_v8  ;;  %v647_v25 = vmax.f32 %v629_v18, 0.0 }
 0x1c5   : > { %v632_v58 = vpop.f32.mrf.mxu1 }
 0x1c6   : > { %v633_v13 = vadd.f32 %v632_v58, %v565_v1  ;;  %v648_v20 = vmax.f32 %v631_v11, 0.0 }
 0x1c7   : > { %v634_v60 = vpop.f32.mrf.mxu1 }
 0x1c8   : > { %v635_v3 = vadd.f32 %v634_v60, %v565_v1  ;;  %v649_v22 = vmax.f32 %v633_v13, 0.0 }
 0x1c9   : > { %v638_v62 = vpop.f32.mrf.mxu1 }
 0x1ca   : > { %v639_v9 = vadd.f32 %v638_v62, %v570_v61  ;;  %v650_v15 = vmax.f32 %v635_v3, 0.0  ;;  %v659_v26 = vpack.c.bf16 %v649_v22, %v647_v25  ;;  %v819_v62 = vld [vmem:[%s1488_s9] sm:$0xf] }
 0x1cb   : > { %v640_v63 = vpop.f32.mrf.mxu1 }
 0x1cc   : > { %v641_v4 = vadd.f32 %v640_v63, %v570_v61  ;;  %v651_v19 = vmax.f32 %v639_v9, 0.0  ;;  %v660_v24 = vpack.c.bf16 %v650_v15, %v648_v20  ;;  %v768_v61 = vld [vmem:[%s1486_s7] sm:$0xf] }
 0x1cd   : > { %v642_v2 = vpop.f32.mrf.mxu1 }
 0x1ce   : > { %v643_v5 = vadd.f32 %v642_v2, %v575_v59  ;;  %v652_v16 = vmax.f32 %v641_v4, 0.0  ;;  %v824_v4 = vpop.permute.xlu0 %823 }
 0x1cf   : > { %v644_v10 = vpop.f32.mrf.mxu1 }
 0x1d0   : > { %v645_v12 = vadd.f32 %v644_v10, %v575_v59  ;;  %v653_v14 = vmax.f32 %v643_v5, 0.0 }
 0x1d2   : > { %v654_v17 = vmax.f32 %v645_v12, 0.0  ;;  %v661_v23 = vpack.c.bf16 %v653_v14, %v651_v19 }
 0x1d4   : > { %v662_v21 = vpack.c.bf16 %v654_v17, %v652_v16 }
 0x1d6   : > { %715 = vmatprep.subr.bf16.mxu0 %v662_v21 }
 0x1d7   : > { %716 = vmatpush1.bf16.msra.mxu0 %v661_v23 }
 0x1d8   : > { %717 = vmatprep.subr.bf16.mxu0 %v660_v24 }
 0x1db   : > { %718 = vmatpush1.bf16.msra.mxu0 %v659_v26 }
 0x1de   : > { %1028 = vmatmul.mubr.msk.bf16.vlgmr.msra.gmra.mxu0 %vm587_vm2, %v1093_v27 }
 0x1df   : > { %745 = vmatprep.mubr.bf16.mxu0 %v1191_v0 }
 0x1e6   : > { %1029 = vmatmul.mubr.msk.bf16.gmra.mxu0 %vm587_vm2, %v1094_v28 }
 0x29e   : > { %v737_v29 = vpop.f32.mrf.mxu0 }
 0x29f   : > { %v738_v52 = vadd.f32 %v737_v29, %v670_v42 }
 0x2a0   : > { %v739_v30 = vpop.f32.mrf.mxu0 }
 0x2a1   : > { %v740_v45 = vadd.f32 %v739_v30, %v670_v42  ;;  %v756_v59 = vmax.f32 %v738_v52, 0.0 }
 0x2a2   : > { %v741_v31 = vpop.f32.mrf.mxu0 }
 0x2a3   : > { %v742_v47 = vadd.f32 %v741_v31, %v675_v37  ;;  %v757_v54 = vmax.f32 %v740_v45, 0.0 }
 0x2a4   : > { %v743_v33 = vpop.f32.mrf.mxu0 }
 0x2a5   : > { %v744_v39 = vadd.f32 %v743_v33, %v675_v37  ;;  %v758_v56 = vmax.f32 %v742_v47, 0.0 }
 0x2a6   : > { %v747_v35 = vpop.f32.mrf.mxu0 }
 0x2a7   : > { %v748_v43 = vadd.f32 %v747_v35, %v680_v34  ;;  %v759_v49 = vmax.f32 %v744_v39, 0.0  ;;  %v764_v60 = vpack.c.bf16 %v758_v56, %v756_v59 }
 0x2a8   : > { %v749_v36 = vpop.f32.mrf.mxu0 }
 0x2a9   : > { %v750_v40 = vadd.f32 %v749_v36, %v680_v34  ;;  %v760_v53 = vmax.f32 %v748_v43, 0.0  ;;  %v765_v58 = vpack.c.bf16 %v759_v49, %v757_v54 }
 0x2aa   : > { %v751_v38 = vpop.f32.mrf.mxu0 }
 0x2ab   : > { %v752_v41 = vadd.f32 %v751_v38, %v685_v32  ;;  %v761_v50 = vmax.f32 %v750_v40, 0.0 }
 0x2ac   : > { %v753_v44 = vpop.f32.mrf.mxu0 }
 0x2ad   : > { %v754_v46 = vadd.f32 %v753_v44, %v685_v32  ;;  %v762_v48 = vmax.f32 %v752_v41, 0.0 }
 0x2af   : > { %v763_v51 = vmax.f32 %v754_v46, 0.0  ;;  %v766_v57 = vpack.c.bf16 %v762_v48, %v760_v53 }
 0x2b1   : > { %v767_v55 = vpack.c.bf16 %v763_v51, %v761_v50 }
 0x2b3   : > { %790 = vmatprep.subr.bf16.mxu1 %v767_v55 }
 0x2b4   : > { %791 = vmatpush1.bf16.msra.mxu1 %v766_v57 }
 0x2b5   : > { %792 = vmatprep.subr.bf16.mxu1 %v765_v58 }
 0x2b8   : > { %793 = vmatpush1.bf16.msra.mxu1 %v764_v60 }
 0x2b9   : > { %841 = vmatprep.subr.bf16.mxu1 %v767_v55 }
 0x2bb   : > { %1030 = vmatmul.mubr.msk.bf16.vlgmr.msra.gmra.mxu1 %vm587_vm2, %v768_v61 }
 0x2bc   : > { %842 = vmatpush1.bf16.msra.mxu1 %v766_v57  ;;  %861 = vmatprep.mubr.bf16.mxu1 %v1191_v0 }
 0x2bd   : > { %843 = vmatprep.subr.bf16.mxu1 %v765_v58 }
 0x2c0   : > { %844 = vmatpush1.bf16.msra.mxu1 %v764_v60 }
 0x2c3   : > { %1031 = vmatmul.mubr.msk.bf16.vlgmr.msra.gmra.mxu1 %vm587_vm2, %v819_v62 }
 0x37b   : > { %v812_v63 = vpop.f32.mrf.mxu1 }
 0x37d   : > { %v814_v1 = vpop.f32.mrf.mxu1 }
 0x37f   : > { %v816_v2 = vpop.f32.mrf.mxu1 }
 0x381   : > { %v817_v3 = vpop.f32.mrf.mxu1 }
 0x383   : > { %v863_v0 = vpop.f32.mrf.mxu1 }
 0x384   : > { %v864_v5 = vadd.f32 %v863_v0, %v824_v4 }
 0x385   : > { %v865_v8 = vpop.f32.mrf.mxu1 }
 0x386   : > { %v872_v9 = vsub.f32 0.0, %v864_v5  ;;  %v866_v10 = vadd.f32 %v865_v8, %v824_v4 }
 0x387   : > { %v867_v11 = vpop.f32.mrf.mxu1 }
 0x388   : > { %v874_v12 = vmul.f32 1.442695, %v872_v9  ;;  %882 = vst [vmem:[%s418_s16] sm:$0xff] %v872_v9  ;;  %v873_v13 = vsub.f32 0.0, %v866_v10 }
 0x389   : > { %v868_v14 = vpop.f32.mrf.mxu1 }
 0x38a   : > { %1095 = vpow2.f32 %v874_v12  ;;  %v876_v15 = vmul.f32 1.442695, %v873_v13  ;;  %883 = vst [vmem:[%s418_s16 + $0x8] sm:$0xff] %v873_v13 }
 0x38b   : > { %1112 = shalt.err (!%p1109_p3)
}
 0x38c   : > { %s1113_s16 = scalar_lea.hbm %s1415_s27, 256  ;;  %s1117_s14 = scalar_lea.hbm %s1491_s12, 1024 }
 0x38d   : > { %p1114_p4 = scmp.ne.s32.totalorder %s1415_s27, %s1113_s16  ;;  %p1118_p9 = scmp.lt.s32.totalorder %s1415_s27, %s1491_s12 }
 0x38e   : > { %p1119_p10 = scmp.lt.s32.totalorder %s1117_s14, %s1113_s16 }
 0x38f   : > { %p1115_p7 = pnand %p1114_p4, %p1297_p5 }
 0x390   : > { %p1120_p11 = por %p1119_p10, %p1118_p9 }
 0x391   : > { %p1116_p8 = pneg %p1115_p7 }
 0x393   : > { %p1121_p12 = pnand %p1120_p11, %p1116_p8 }
 0x395   : > { %1124 = shalt.err (!%p1121_p12)
}
 0x396   : > { %1043 = dma.vmem_to_hbm [thread:$0]  (%p1297_p5), %s1417_s17, 256, %s1415_s27, %s890_s30   ;;  %1097 = vpow2.f32 %v876_v15  ;;  %v773_v16 = vpop.permute.xlu1 %772 }
 0x397   : > { %v813_v17 = vadd.f32 %v812_v63, %v773_v16  ;;  %v815_v18 = vadd.f32 %v814_v1, %v773_v16  ;;  %v1096_v20 = vpop.eup %1095  ;;  %s1504_s28 = sshll.u32 %s1404_s26, 4  ;;  %s1505_s19 = sshll.u32 %s1280_s25, 8 }
 0x398   : > { %s411_s29 = scalar_lea.vmem [#allocation2], %s1504_s28  ;;  %s902_s30 = scalar_lea.hbm %s1490_s11, %s1505_s19 }
 0x399   : > { %v870_v19 = vsub.f32 %v1332_v7, %v813_v17  ;;  %s904_s23 = sshll.u32 %s411_s29, 4  ;;  %v871_v21 = vsub.f32 %v1330_v6, %v815_v18  ;;  %s885_s20 = scalar_lea.sflag [#allocation3], %s1404_s26  ;;  %s905_s23 = int_to_ptr.vmem [resolvable:$true] %s904_s23 }
 0x39a   : > { %s1125_s16 = scalar_lea.vmem %s905_s23, 256  ;;  %s1193_s18 = smov [#allocation2]  }
 0x39b   : > { %v878_v22 = vmul.f32 %v1096_v20, %v870_v19  ;;  %p1126_p13 = scmp.ne.s32.totalorder %s905_s23, %s1125_s16  ;;  %s1129_s15 = sshll.u32 %s1193_s18, 4  ;;  %s1130_s15 = int_to_ptr.vmem [resolvable:$false] %s1129_s15 }
 0x39c   : > { %s1131_s14 = scalar_lea.vmem %s1130_s15, 512  ;;  %p1132_p2 = scmp.lt.s32.totalorder %s905_s23, %s1130_s15 }
 0x39d   : > { %880 = vst [vmem:[%s411_s29] sm:$0xff] %v878_v22  ;;  %p1127_p0 = pnand %p1126_p13, %p1297_p5  ;;  %p1133_p3 = scmp.lt.s32.totalorder %s1131_s14, %s1125_s16 }
 0x39f   : > { %p1128_p1 = pneg %p1127_p0  ;;  %p1134_p4 = por %p1133_p3, %p1132_p2 }
 0x3a1   : > { %p1135_p7 = pnand %p1134_p4, %p1128_p1 }
 0x3a3   : > { %v1098_v23 = vpop.eup %1097 }
 0x3a4   : > { %v879_v24 = vmul.f32 %v1098_v23, %v871_v21 }
 0x3a6   : > { %881 = vst [vmem:[%s411_s29 + $0x8] sm:$0xff] %v879_v24 }
 0x3a7   : > { %1138 = shalt.err (!%p1135_p7)
}
 0x3a8   : > { %s1139_s25 = scalar_lea.hbm %s902_s30, 256  ;;  %s1143_s29 = scalar_lea.hbm %s1490_s11, 1024 }
 0x3a9   : > { %p1140_p8 = scmp.ne.s32.totalorder %s902_s30, %s1139_s25  ;;  %p1144_p11 = scmp.lt.s32.totalorder %s902_s30, %s1490_s11 }
 0x3aa   : > { %p1145_p12 = scmp.lt.s32.totalorder %s1143_s29, %s1139_s25 }
 0x3ab   : > { %p1141_p9 = pnand %p1140_p8, %p1297_p5 }
 0x3ac   : > { %p1146_p13 = por %p1145_p12, %p1144_p11 }
 0x3ad   : > { %p1142_p10 = pneg %p1141_p9 }
 0x3af   : > { %p1147_p0 = pnand %p1146_p13, %p1142_p10 }
 0x3b1   : > { %1150 = shalt.err (!%p1147_p0)
}
 0x3b2   : > { %1042 = dma.vmem_to_hbm [thread:$0]  (%p1297_p5), %s905_s23, 256, %s902_s30, %s885_s20  }
 0x3b3 PF: > { %p1053_p1 = scmp.ge.s32.totalorder %s1189_s24, 2  ;;  %s930_s16 = sand.u32 1, %s1177_s21  }
 0x3b4   : > { %s931_s18 = scalar_lea.sflag [#allocation3], %s930_s16 }
 0x3b5   : > { %p1047_p2 = pnand %p1053_p1, %p1301_p6 }
 0x3b7   : > { %p1048_p3 = pneg %p1047_p2 }
 0x3b9   : > { %1168 = dma.done.wait (%p1048_p3), %s931_s18, 256  }
 0x3ba   : > { %1170 = vsyncadd (%p1048_p3), %s931_s18, 4294967040  ;;  %s940_s15 = scalar_lea.sflag [#allocation5], %s930_s16 }
 0x3bb   : > { %1172 = dma.done.wait (%p1048_p3), %s940_s15, 256  }
 0x3bc   : > { %1174 = vsyncadd (%p1048_p3), %s940_s15, 4294967040  ;;  %s1507_s24 = sld [smem:[#allocation9_spill]]  ;;  %s1510_s21 = smov %s1181_s22 }
 0x3bd   : > { %s1508_s14 = sld [smem:[#allocation8_spill]] }
 0x3be   : > { %s1509_s23 = sld [smem:[#allocation10_spill]] }
 0x3c2   : > { %p26_p5 = scmp.ge.s32.totalorder %s1507_s24, 6  }
 0x3c3   : > { %s1511_s22 = smov %s1508_s14 }
 0x3c4   :  { %28 = sbr.rel (!%p26_p5) target bundleno = 5 (0x5), region = 116 }
 0x3c9   :  { %945 = vsyncpa [#allocation3], 1 }
 0x3ca   :  { %947 = vsyncpa [#allocation3 + $0x1], 1 }
 0x3cb   :  { %948 = vsyncpa [#allocation5], 1 }
 0x3cc   :  { %950 = vsyncpa [#allocation5 + $0x1], 1 }

</bundles_post_ra>
